<compile_context>
chip_gen: v6e
topology: v6e:2x2x1
jax: 0.10.0
libtpu: 0.0.40
codegen_flags: <defaults>
</compile_context>

<pallas_src>
import jax
import jax.numpy as jnp
from jax.experimental import pallas as pl
from jax.experimental.pallas import tpu as pltpu


def generator_kernel(x_ref, w1_ref, b1_ref, wh_ref, bh_ref, w5_ref, b5_ref,
                     o_ref):
    # x_ref : (in_size, tile_b)  activations, batch on lanes
    # w1_ref: (H, in_size) bf16  nn.Linear native (out, in) layout; b1: (H, 1) f32
    # wh_ref: (3, H, H)   bf16;  bh_ref: (3, H, 1) f32
    # w5_ref: (out_size, H) bf16; b5_ref: (out_size, 1) f32
    h = jnp.dot(w1_ref[...], x_ref[...].astype(jnp.bfloat16),
                preferred_element_type=jnp.float32) + b1_ref[...]
    h = jnp.maximum(h, 0.0)

    for k in range(3):  # static unroll of the three (H, H) hidden layers
        h = jnp.dot(wh_ref[k], h.astype(jnp.bfloat16),
                    preferred_element_type=jnp.float32) + bh_ref[k]
        h = jnp.maximum(h, 0.0)

    # Head (no activation): (out_size, H) @ (H, tile_b) -> lane-dense store.
    out = jnp.dot(w5_ref[...], h.astype(jnp.bfloat16),
                  preferred_element_type=jnp.float32) + b5_ref[...]
    o_ref[...] = out.astype(o_ref.dtype)


def _round_up(n, m):
    return ((n + m - 1) // m) * m


def generator_forward(x, params, *, tile_b=2048):
    """x: (B, input_size) f32. params: (w1, b1, wh, bh, w5, b5) from init_params."""
    w1, b1, wh, bh, w5, b5 = params
    B, in_size = x.shape
    out_size = w5.shape[0]

    # Lane-aligned batch tile (multiple of 128), capped so the grid has >= 2
    # steps when the batch allows it (both v7x TensorCores get work).
    tb = min(_round_up(tile_b, 128), _round_up(pl.cdiv(B, 2), 128))
    Bp = _round_up(B, tb)

    x_t = x.T                                     # (in_size, B): batch -> lanes
    if Bp != B:
        x_t = jnp.pad(x_t, ((0, 0), (0, Bp - B)))

    grid = (Bp // tb,)
    out_t = pl.pallas_call(
        generator_kernel,
        out_shape=jax.ShapeDtypeStruct((out_size, Bp), jnp.float32),
        grid=grid,
        in_specs=[
            pl.BlockSpec((in_size, tb), lambda i: (0, i)),   # x: tiled over batch
            pl.BlockSpec(w1.shape, lambda i: (0, 0)),        # weights: VMEM-resident
            pl.BlockSpec(b1.shape, lambda i: (0, 0)),
            pl.BlockSpec(wh.shape, lambda i: (0, 0, 0)),
            pl.BlockSpec(bh.shape, lambda i: (0, 0, 0)),
            pl.BlockSpec(w5.shape, lambda i: (0, 0)),
            pl.BlockSpec(b5.shape, lambda i: (0, 0)),
        ],
        out_specs=pl.BlockSpec((out_size, tb), lambda i: (0, i)),
        compiler_params=pltpu.CompilerParams(
            dimension_semantics=("parallel",)),
        # TODO(synk): for large hidden_size, add K/N weight tiling with an
        # accumulator, pipeline_mode=pl.Buffered(1) on the constant weight
        # specs, and an explicit vmem_limit_bytes so the resident-weight
        # strategy fits v7x's 64 MiB VMEM (fp8 weights are a further option
        # on v7x only).
    )(x_t, w1, b1, wh, bh, w5, b5)

    return out_t[:, :B].T                         # back to (B, out_size)


generator_forward_jit = jax.jit(generator_forward, static_argnames=("tile_b",))


def init_params(key, input_size, hidden_size, output_size):
    """nn.Linear-style U(-1/sqrt(fan_in), +1/sqrt(fan_in)) init.

    Weights in native (out_features, in_features) layout, bf16 (MXU-native);
    biases as (out_features, 1) f32.  The three hidden layers are stacked once
    here so no per-call jnp.stack is needed.
    """
    def linear(k, fan_in, fan_out):
        kw, kb = jax.random.split(k)
        bound = float(fan_in) ** -0.5
        w = jax.random.uniform(kw, (fan_out, fan_in), jnp.float32,
                               -bound, bound).astype(jnp.bfloat16)
        b = jax.random.uniform(kb, (fan_out, 1), jnp.float32, -bound, bound)
        return w, b

    keys = jax.random.split(key, 5)
    w1, b1 = linear(keys[0], input_size, hidden_size)
    hidden = [linear(keys[1 + i], hidden_size, hidden_size) for i in range(3)]
    wh = jnp.stack([w for w, _ in hidden])        # (3, H, H) bf16
    bh = jnp.stack([b for _, b in hidden])        # (3, H, 1) f32
    w5, b5 = linear(keys[4], hidden_size, output_size)
    return (w1, b1, wh, bh, w5, b5)


def reference_forward(x, params):
    """Pure-JAX reference using the same bf16 operands / f32 accumulation."""
    w1, b1, wh, bh, w5, b5 = params
    h = jnp.dot(w1, x.T.astype(jnp.bfloat16),
                preferred_element_type=jnp.float32) + b1
    h = jnp.maximum(h, 0.0)
    for k in range(3):
        h = jnp.dot(wh[k], h.astype(jnp.bfloat16),
                    preferred_element_type=jnp.float32) + bh[k]
        h = jnp.maximum(h, 0.0)
    out = jnp.dot(w5, h.astype(jnp.bfloat16),
                  preferred_element_type=jnp.float32) + b5
    return out.T


if __name__ == "__main__":
    input_size, hidden_size, output_size = 4, 32, 1

    key = jax.random.PRNGKey(0)
    key, kp = jax.random.split(key)
    params = init_params(kp, input_size, hidden_size, output_size)

    # Small batch (single-tile grid) plus a larger batch that exercises a
    # multi-step grid (pipelining + megacore-parallel path).
    for batch, tb in ((64, 2048), (1024, 512)):
        key, kx = jax.random.split(key)
        x = jax.random.normal(kx, (batch, input_size), jnp.float32)
        out = generator_forward_jit(x, params, tile_b=tb)
        out = jax.block_until_ready(out)
        ref = reference_forward(x, params)
        assert out.shape == (batch, output_size)
        assert jnp.allclose(out, ref, atol=2e-3, rtol=2e-3), \
            f"mismatch vs reference at batch={batch}"

    print("KERNEL_OK")
</pallas_src>

<mosaic_0001>
module attributes {stable_mosaic.version = 11 : i64} {
  func.func @generator_kernel(%arg0: i32, %arg1: memref<4x128xf32, #tpu.memory_space<vmem>>, %arg2: memref<32x4xbf16, #tpu.memory_space<vmem>>, %arg3: memref<32x1xf32, #tpu.memory_space<vmem>>, %arg4: memref<3x32x32xbf16, #tpu.memory_space<vmem>>, %arg5: memref<3x32x1xf32, #tpu.memory_space<vmem>>, %arg6: memref<1x32xbf16, #tpu.memory_space<vmem>>, %arg7: memref<1x1xf32, #tpu.memory_space<vmem>>, %arg8: memref<1x128xf32, #tpu.memory_space<vmem>>) attributes {dimension_semantics = [#tpu.dimension_semantics<parallel>], iteration_bounds = array<i64: 1>, scalar_prefetch = 0 : i64, scratch_operands = 0 : i64, tpu.core_type = #tpu.core_type<tc>, window_params = [{transform_indices = @transform_0, window_bounds = array<i64: 4, 128>}, {pipeline_mode = #tpu.pipeline_mode<synchronous>, transform_indices = @transform_1, window_bounds = array<i64: 32, 4>}, {pipeline_mode = #tpu.pipeline_mode<synchronous>, transform_indices = @transform_2, window_bounds = array<i64: 32, 1>}, {pipeline_mode = #tpu.pipeline_mode<synchronous>, transform_indices = @transform_3, window_bounds = array<i64: 3, 32, 32>}, {pipeline_mode = #tpu.pipeline_mode<synchronous>, transform_indices = @transform_4, window_bounds = array<i64: 3, 32, 1>}, {pipeline_mode = #tpu.pipeline_mode<synchronous>, transform_indices = @transform_5, window_bounds = array<i64: 1, 32>}, {pipeline_mode = #tpu.pipeline_mode<synchronous>, transform_indices = @transform_6, window_bounds = array<i64: 1, 1>}, {transform_indices = @transform_7, window_bounds = array<i64: 1, 128>}]} {
    %c0 = arith.constant 0 : index
    %c0_0 = arith.constant 0 : index
    %0 = vector.load %arg2[%c0, %c0_0] : memref<32x4xbf16, #tpu.memory_space<vmem>>, vector<32x4xbf16>
    %c0_1 = arith.constant 0 : index
    %c0_2 = arith.constant 0 : index
    %1 = vector.load %arg1[%c0_1, %c0_2] : memref<4x128xf32, #tpu.memory_space<vmem>>, vector<4x128xf32>
    %2 = arith.truncf %1 : vector<4x128xf32> to vector<4x128xbf16>
    %cst = arith.constant dense<0.000000e+00> : vector<32x128xf32>
    %3 = tpu.matmul %0, %2, %cst {dimension_numbers = #tpu.dot_dimension_numbers<[1], [0], [0], [1], [0, 0, 1, 1], [], []>} : vector<32x4xbf16>, vector<4x128xbf16>, vector<32x128xf32> -> vector<32x128xf32>
    %c0_3 = arith.constant 0 : index
    %c0_4 = arith.constant 0 : index
    %4 = vector.load %arg3[%c0_3, %c0_4] : memref<32x1xf32, #tpu.memory_space<vmem>>, vector<32x1xf32>
    %5 = vector.broadcast %4 : vector<32x1xf32> to vector<32x128xf32>
    %6 = arith.addf %3, %5 : vector<32x128xf32>
    %cst_5 = arith.constant 0.000000e+00 : f32
    %7 = vector.broadcast %cst_5 : f32 to vector<32x128xf32>
    %8 = arith.maximumf %6, %7 : vector<32x128xf32>
    %c0_6 = arith.constant 0 : index
    %c0_7 = arith.constant 0 : index
    %c0_8 = arith.constant 0 : index
    %9 = vector.load %arg4[%c0_6, %c0_7, %c0_8] : memref<3x32x32xbf16, #tpu.memory_space<vmem>>, vector<1x32x32xbf16>
    %10 = vector.shape_cast %9 : vector<1x32x32xbf16> to vector<32x32xbf16>
    %11 = arith.truncf %8 : vector<32x128xf32> to vector<32x128xbf16>
    %cst_9 = arith.constant dense<0.000000e+00> : vector<32x128xf32>
    %12 = tpu.matmul %10, %11, %cst_9 {dimension_numbers = #tpu.dot_dimension_numbers<[1], [0], [0], [1], [0, 0, 1, 1], [], []>} : vector<32x32xbf16>, vector<32x128xbf16>, vector<32x128xf32> -> vector<32x128xf32>
    %c0_10 = arith.constant 0 : index
    %c0_11 = arith.constant 0 : index
    %c0_12 = arith.constant 0 : index
    %13 = vector.load %arg5[%c0_10, %c0_11, %c0_12] : memref<3x32x1xf32, #tpu.memory_space<vmem>>, vector<1x32x1xf32>
    %14 = vector.shape_cast %13 : vector<1x32x1xf32> to vector<32x1xf32>
    %15 = vector.broadcast %14 : vector<32x1xf32> to vector<32x128xf32>
    %16 = arith.addf %12, %15 : vector<32x128xf32>
    %cst_13 = arith.constant 0.000000e+00 : f32
    %17 = vector.broadcast %cst_13 : f32 to vector<32x128xf32>
    %18 = arith.maximumf %16, %17 : vector<32x128xf32>
    %c1 = arith.constant 1 : index
    %c0_14 = arith.constant 0 : index
    %c0_15 = arith.constant 0 : index
    %19 = vector.load %arg4[%c1, %c0_14, %c0_15] : memref<3x32x32xbf16, #tpu.memory_space<vmem>>, vector<1x32x32xbf16>
    %20 = vector.shape_cast %19 : vector<1x32x32xbf16> to vector<32x32xbf16>
    %21 = arith.truncf %18 : vector<32x128xf32> to vector<32x128xbf16>
    %cst_16 = arith.constant dense<0.000000e+00> : vector<32x128xf32>
    %22 = tpu.matmul %20, %21, %cst_16 {dimension_numbers = #tpu.dot_dimension_numbers<[1], [0], [0], [1], [0, 0, 1, 1], [], []>} : vector<32x32xbf16>, vector<32x128xbf16>, vector<32x128xf32> -> vector<32x128xf32>
    %c1_17 = arith.constant 1 : index
    %c0_18 = arith.constant 0 : index
    %c0_19 = arith.constant 0 : index
    %23 = vector.load %arg5[%c1_17, %c0_18, %c0_19] : memref<3x32x1xf32, #tpu.memory_space<vmem>>, vector<1x32x1xf32>
    %24 = vector.shape_cast %23 : vector<1x32x1xf32> to vector<32x1xf32>
    %25 = vector.broadcast %24 : vector<32x1xf32> to vector<32x128xf32>
    %26 = arith.addf %22, %25 : vector<32x128xf32>
    %cst_20 = arith.constant 0.000000e+00 : f32
    %27 = vector.broadcast %cst_20 : f32 to vector<32x128xf32>
    %28 = arith.maximumf %26, %27 : vector<32x128xf32>
    %c2 = arith.constant 2 : index
    %c0_21 = arith.constant 0 : index
    %c0_22 = arith.constant 0 : index
    %29 = vector.load %arg4[%c2, %c0_21, %c0_22] : memref<3x32x32xbf16, #tpu.memory_space<vmem>>, vector<1x32x32xbf16>
    %30 = vector.shape_cast %29 : vector<1x32x32xbf16> to vector<32x32xbf16>
    %31 = arith.truncf %28 : vector<32x128xf32> to vector<32x128xbf16>
    %cst_23 = arith.constant dense<0.000000e+00> : vector<32x128xf32>
    %32 = tpu.matmul %30, %31, %cst_23 {dimension_numbers = #tpu.dot_dimension_numbers<[1], [0], [0], [1], [0, 0, 1, 1], [], []>} : vector<32x32xbf16>, vector<32x128xbf16>, vector<32x128xf32> -> vector<32x128xf32>
    %c2_24 = arith.constant 2 : index
    %c0_25 = arith.constant 0 : index
    %c0_26 = arith.constant 0 : index
    %33 = vector.load %arg5[%c2_24, %c0_25, %c0_26] : memref<3x32x1xf32, #tpu.memory_space<vmem>>, vector<1x32x1xf32>
    %34 = vector.shape_cast %33 : vector<1x32x1xf32> to vector<32x1xf32>
    %35 = vector.broadcast %34 : vector<32x1xf32> to vector<32x128xf32>
    %36 = arith.addf %32, %35 : vector<32x128xf32>
    %cst_27 = arith.constant 0.000000e+00 : f32
    %37 = vector.broadcast %cst_27 : f32 to vector<32x128xf32>
    %38 = arith.maximumf %36, %37 : vector<32x128xf32>
    %c0_28 = arith.constant 0 : index
    %c0_29 = arith.constant 0 : index
    %39 = vector.load %arg6[%c0_28, %c0_29] : memref<1x32xbf16, #tpu.memory_space<vmem>>, vector<1x32xbf16>
    %40 = arith.truncf %38 : vector<32x128xf32> to vector<32x128xbf16>
    %cst_30 = arith.constant dense<0.000000e+00> : vector<1x128xf32>
    %41 = tpu.matmul %39, %40, %cst_30 {dimension_numbers = #tpu.dot_dimension_numbers<[1], [0], [0], [1], [0, 0, 1, 1], [], []>} : vector<1x32xbf16>, vector<32x128xbf16>, vector<1x128xf32> -> vector<1x128xf32>
    %c0_31 = arith.constant 0 : index
    %c0_32 = arith.constant 0 : index
    %42 = vector.load %arg7[%c0_31, %c0_32] : memref<1x1xf32, #tpu.memory_space<vmem>>, vector<1x1xf32>
    %43 = vector.broadcast %42 : vector<1x1xf32> to vector<1x128xf32>
    %44 = arith.addf %41, %43 : vector<1x128xf32>
    %c0_33 = arith.constant 0 : index
    %c0_34 = arith.constant 0 : index
    %45 = vector.load %arg8[%c0_33, %c0_34] : memref<1x128xf32, #tpu.memory_space<vmem>>, vector<1x128xf32>
    tpu.vector_store %arg8[%c0_33, %c0_34], %44 {strides = array<i32>} : memref<1x128xf32, #tpu.memory_space<vmem>>, vector<1x128xf32>,
    return
  }
  func.func @transform_0(%arg0: i32) -> (i32, i32) {
    %c0_i32 = arith.constant 0 : i32
    %c0_i32_0 = arith.constant 0 : i32
    return %c0_i32, %arg0 : i32, i32
  }
  func.func @transform_1(%arg0: i32) -> (i32, i32) {
    %c0_i32 = arith.constant 0 : i32
    %c0_i32_0 = arith.constant 0 : i32
    %c0_i32_1 = arith.constant 0 : i32
    return %c0_i32, %c0_i32_0 : i32, i32
  }
  func.func @transform_2(%arg0: i32) -> (i32, i32) {
    %c0_i32 = arith.constant 0 : i32
    %c0_i32_0 = arith.constant 0 : i32
    %c0_i32_1 = arith.constant 0 : i32
    return %c0_i32, %c0_i32_0 : i32, i32
  }
  func.func @transform_3(%arg0: i32) -> (i32, i32, i32) {
    %c0_i32 = arith.constant 0 : i32
    %c0_i32_0 = arith.constant 0 : i32
    %c0_i32_1 = arith.constant 0 : i32
    %c0_i32_2 = arith.constant 0 : i32
    return %c0_i32, %c0_i32_0, %c0_i32_1 : i32, i32, i32
  }
  func.func @transform_4(%arg0: i32) -> (i32, i32, i32) {
    %c0_i32 = arith.constant 0 : i32
    %c0_i32_0 = arith.constant 0 : i32
    %c0_i32_1 = arith.constant 0 : i32
    %c0_i32_2 = arith.constant 0 : i32
    return %c0_i32, %c0_i32_0, %c0_i32_1 : i32, i32, i32
  }
  func.func @transform_5(%arg0: i32) -> (i32, i32) {
    %c0_i32 = arith.constant 0 : i32
    %c0_i32_0 = arith.constant 0 : i32
    %c0_i32_1 = arith.constant 0 : i32
    return %c0_i32, %c0_i32_0 : i32, i32
  }
  func.func @transform_6(%arg0: i32) -> (i32, i32) {
    %c0_i32 = arith.constant 0 : i32
    %c0_i32_0 = arith.constant 0 : i32
    %c0_i32_1 = arith.constant 0 : i32
    return %c0_i32, %c0_i32_0 : i32, i32
  }
  func.func @transform_7(%arg0: i32) -> (i32, i32) {
    %c0_i32 = arith.constant 0 : i32
    %c0_i32_0 = arith.constant 0 : i32
    return %c0_i32, %arg0 : i32, i32
  }
}

</mosaic_0001>

<bundles_post_ra>
// kernel: generator_forward.1
= control target key start
LH: loop header
LB: loop body
LE: loop exit
PB: predicated region body
PF: predicated region fallthrough
CT: control target
= control target key end

     0   :  { %vm76_vm0 = vcmask 1041408   ;;  %vm69_vm1 = vcmask 31744   ;;  %v599_v1 = vmov 0   ;;  %vm173_vm2 = vcmask 261120   ;;  %s735_s0 = inlined_call_operand.vmem [shape: f32[4,128], index: 0, kind: input, shape index: {}]   ;;  %s736_s1 = inlined_call_operand.vmem [shape: bf16[32,4], index: 1, kind: input, shape index: {}]   ;;  %s737_s2 = inlined_call_operand.vmem [shape: f32[32,1], index: 2, kind: input, shape index: {}]   ;;  %s738_s6 = inlined_call_operand.<no memory space> [shape: f32[1,1], index: 6, kind: input, shape index: {}]   ;;  %s739_s4 = inlined_call_operand.vmem [shape: f32[3,32,1], index: 4, kind: input, shape index: {}]   ;;  %s740_s3 = inlined_call_operand.vmem [shape: bf16[3,32,32], index: 3, kind: input, shape index: {}]   ;;  %s741_s5 = inlined_call_operand.vmem [shape: bf16[1,32], index: 5, kind: input, shape index: {}]   ;;  %s742_s7 = inlined_call_operand.vmem [shape: f32[1,128], index: 7, kind: output, shape index: {}]  }
   0x1   :  { %v33_v0 = vld [vmem:[%s735_s0] sm:$0xf]  ;;  %589 = vset.pattern.permute.xlu0 %v599_v1  ;;  %590 = vset.pattern.permute.xlu1 %v599_v1  ;;  %v12_v2 = vstv %s738_s6  ;;  %v37_v5 = vld [vmem:[%s737_s2 + $0x10] sm:$0xff]  ;;  %v592_v7 = vld [vmem:[%s736_s1 + $0x8] sm:$0xff]   ;;  %vm601_vm3 = vmmov 0  }
   0x2   :  { %v34_v3 = vpack.c.bf16 %v33_v0, %v33_v0  ;;  %v591_v4 = vld [vmem:[%s736_s1] sm:$0xff]   ;;  %13 = vst [vmem:[#allocation2] sm:$0x1] %v12_v2  ;;  %51 = vperm.xlu0 %589, %v37_v5   ;;  %v38_v9 = vld [vmem:[%s737_s2 + $0x18] sm:$0xff]  ;;  %v36_v10 = vld [vmem:[%s737_s2 + $0x8] sm:$0xff] }
   0x3   :  { %549 = vmatprep.mubr.msk.bf16.mxu0 %vm69_vm1, %v591_v4  ;;  %v35_v8 = vld [vmem:[%s737_s2] sm:$0xff]  ;;  %v141_v11 = vld [vmem:[%s739_s4 + $0x10] sm:$0xff]  ;;  %v142_v12 = vld [vmem:[%s739_s4 + $0x18] sm:$0xff] }
   0x4   :  { %585 = vmatprep.subr.msk.bf16.mxu0 %vm76_vm0, %v34_v3  ;;  %v78_v6 = vsel %vm76_vm0, %v34_v3, 0  ;;  %41 = vperm.xlu1 %590, %v35_v8   ;;  %v139_v13 = vld [vmem:[%s739_s4] sm:$0xff]  ;;  %v140_v14 = vld [vmem:[%s739_s4 + $0x8] sm:$0xff]  ;;  %v510_v15 = vld [vmem:[%s739_s4 + $0x30] sm:$0xff] }
   0x5   :  { %548 = vmatpush3.bf16.msra.mxu0 %v78_v6  ;;  %v511_v16 = vld [vmem:[%s739_s4 + $0x38] sm:$0xff]  ;;  %v508_v17 = vld [vmem:[%s739_s4 + $0x20] sm:$0xff]  ;;  %v509_v18 = vld [vmem:[%s739_s4 + $0x28] sm:$0xff] }
   0x6   :  { %56 = vperm.xlu0 %589, %v38_v9   ;;  %v522_v19 = vld [vmem:[%s739_s4 + $0x50] sm:$0xff]  ;;  %v523_v20 = vld [vmem:[%s739_s4 + $0x58] sm:$0xff]  ;;  %v520_v21 = vld [vmem:[%s739_s4 + $0x40] sm:$0xff] }
   0x7   :  { %v521_v22 = vld [vmem:[%s739_s4 + $0x48] sm:$0xff]  ;;  %v593_v24 = vld [vmem:[%s740_s3] sm:$0xff]   ;;  %v595_v44 = vld [vmem:[%s740_s3 + $0x10] sm:$0xff]  }
   0x8   :  { %550 = vmatmul.mubr.msk.bf16.vlgmr.msra.gmra.mxu0 %vm69_vm1, %v592_v7  ;;  %46 = vperm.xlu1 %590, %v36_v10   ;;  %v594_v43 = vld [vmem:[%s740_s3 + $0x8] sm:$0xff]   ;;  %v596_v63 = vld [vmem:[%s740_s3 + $0x18] sm:$0xff]   ;;  %v597_v0 = vld [vmem:[%s740_s3 + $0x20] sm:$0xff]  }
   0x9   :  { %v438_v23 = vld [vmem:[#allocation2] sm:$0x1]  ;;  %557 = vmatprep.mubr.msk.bf16.mxu1 %vm173_vm2, %v593_v24  ;;  %565 = vmatprep.mubr.msk.bf16.mxu0 %vm173_vm2, %v595_v44 }
   0xa   :  { %155 = vperm.xlu0 %589, %v141_v11  }
   0xc   :  { %160 = vperm.xlu1 %590, %v142_v12  }
   0xe   :  { %145 = vperm.xlu0 %589, %v139_v13  }
  0x10   :  { %150 = vperm.xlu1 %590, %v140_v14  }
  0x12   :  { %257 = vperm.xlu0 %589, %v510_v15  }
  0x14   :  { %262 = vperm.xlu1 %590, %v511_v16  }
  0x16   :  { %247 = vperm.xlu0 %589, %v508_v17  }
  0x18   :  { %252 = vperm.xlu1 %590, %v509_v18  }
  0x1a   :  { %358 = vperm.xlu0 %589, %v522_v19   ;;  %v598_v19 = vld [vmem:[%s740_s3 + $0x28] sm:$0xff]  }
  0x1c   :  { %363 = vperm.xlu1 %590, %v523_v20   ;;  %v600_v20 = vmov 0.0  }
  0x1e   :  { %348 = vperm.xlu0 %589, %v520_v21  }
  0x20   :  { %353 = vperm.xlu1 %590, %v521_v22  }
  0x22   :  { %441 = vperm.xlu0 %589, %v438_v23  }
  0x7d   :  { %v52_v25 = vpop.permute.xlu0 %51 }
  0x7f   :  { %v42_v26 = vpop.permute.xlu1 %41 }
  0x81   :  { %v57_v30 = vpop.permute.xlu0 %56 }
  0x83   :  { %v47_v34 = vpop.permute.xlu1 %46 }
  0x85   :  { %v156_v45 = vpop.permute.xlu0 %155 }
  0x87   :  { %v161_v46 = vpop.permute.xlu1 %160 }
  0x89   :  { %v146_v50 = vpop.permute.xlu0 %145 }
  0x8b   :  { %v151_v54 = vpop.permute.xlu1 %150 }
  0x8d   :  { %v258_v1 = vpop.permute.xlu0 %257 }
  0x8f   :  { %v263_v2 = vpop.permute.xlu1 %262 }
  0x91   :  { %v248_v6 = vpop.permute.xlu0 %247 }
  0x93   :  { %v253_v10 = vpop.permute.xlu1 %252 }
  0x95   :  { %v359_v21 = vpop.permute.xlu0 %358 }
  0x97   :  { %v364_v22 = vpop.permute.xlu1 %363 }
  0xc8   :  { %v551_v27 = vpop.f32.mrf.mxu0 }
  0xc9   :  { %v123_v29 = vadd.f32 %v551_v27, %v52_v25  ;;  %v349_v27 = vpop.permute.xlu0 %348 }
  0xca   :  { %v114_v28 = vpop.f32.mrf.mxu0 }
  0xcb   :  { %v115_v32 = vadd.f32 %v114_v28, %v42_v26  ;;  %v131_v36 = vmax.f32 %v123_v29, 0.0  ;;  %v354_v29 = vpop.permute.xlu1 %353 }
  0xcc   :  { %v552_v31 = vpop.f32.mrf.mxu0 }
  0xcd   :  { %v126_v33 = vadd.f32 %v552_v31, %v57_v30  ;;  %v129_v39 = vmax.f32 %v115_v32, 0.0 }
  0xce   :  { %v117_v35 = vpop.f32.mrf.mxu0 }
  0xcf   :  { %v132_v37 = vmax.f32 %v126_v33, 0.0  ;;  %v118_v38 = vadd.f32 %v117_v35, %v47_v34 }
  0xd1   :  { %v130_v40 = vmax.f32 %v118_v38, 0.0  ;;  %v138_v41 = vpack.c.bf16 %v132_v37, %v131_v36 }
  0xd3   :  { %v137_v42 = vpack.c.bf16 %v130_v40, %v129_v39  ;;  %553 = vmatprep.subr.bf16.mxu1 %v138_v41  ;;  %v435_v39 = vld [vmem:[%s741_s5] sm:$0x1]  ;;  %v444_v40 = vlaneseq }
  0xd4   :  { %554 = vmatpush3.bf16.msra.mxu1 %v138_v41 }
  0xd5   :  { %555 = vmatprep.subr.bf16.mxu1 %v137_v42  ;;  %v445_v41 = vshrl.u32 %v444_v40, 7 }
  0xd8   :  { %556 = vmatpush3.bf16.msra.mxu1 %v137_v42  ;;  %v446_v42 = vsub.s32 0, %v445_v41 }
  0xdb   :  { %558 = vmatmul.mubr.msk.bf16.vlgmr.msra.gmra.mxu1 %vm173_vm2, %v594_v43  ;;  %v442_v43 = vpop.permute.xlu0 %441 }
  0xdc   :  { %573 = vmatprep.mubr.msk.bf16.mxu1 %vm173_vm2, %v597_v0  ;;  %v447_v44 = vrot.slane %v442_v43, %v446_v42 }
 0x19b   :  { %v559_v47 = vpop.f32.mrf.mxu1 }
 0x19c   :  { %v223_v49 = vadd.f32 %v559_v47, %v156_v45 }
 0x19d   :  { %v214_v48 = vpop.f32.mrf.mxu1 }
 0x19e   :  { %v215_v52 = vadd.f32 %v214_v48, %v146_v50  ;;  %v231_v56 = vmax.f32 %v223_v49, 0.0 }
 0x19f   :  { %v560_v51 = vpop.f32.mrf.mxu1 }
 0x1a0   :  { %v226_v53 = vadd.f32 %v560_v51, %v161_v46  ;;  %v229_v59 = vmax.f32 %v215_v52, 0.0 }
 0x1a1   :  { %v217_v55 = vpop.f32.mrf.mxu1 }
 0x1a2   :  { %v232_v57 = vmax.f32 %v226_v53, 0.0  ;;  %v218_v58 = vadd.f32 %v217_v55, %v151_v54 }
 0x1a4   :  { %v239_v60 = vpack.c.bf16 %v232_v57, %v231_v56  ;;  %v230_v61 = vmax.f32 %v218_v58, 0.0 }
 0x1a6   :  { %v238_v62 = vpack.c.bf16 %v230_v61, %v229_v59  ;;  %561 = vmatprep.subr.bf16.mxu0 %v239_v60 }
 0x1a7   :  { %562 = vmatpush3.bf16.msra.mxu0 %v239_v60 }
 0x1a8   :  { %563 = vmatprep.subr.bf16.mxu0 %v238_v62 }
 0x1ab   :  { %564 = vmatpush3.bf16.msra.mxu0 %v238_v62 }
 0x1ac   :  { %577 = vmatprep.subr.bf16.mxu0 %v600_v20 }
 0x1ae   :  { %566 = vmatmul.mubr.msk.bf16.vlgmr.msra.gmra.mxu0 %vm173_vm2, %v596_v63 }
 0x1af   :  { %581 = vmatprep.mubr.msk.bf16.mxu0 %vm601_vm3, %v600_v20 }
 0x26e   :  { %v567_v3 = vpop.f32.mrf.mxu0 }
 0x26f   :  { %v324_v5 = vadd.f32 %v567_v3, %v258_v1 }
 0x270   :  { %v315_v4 = vpop.f32.mrf.mxu0 }
 0x271   :  { %v316_v8 = vadd.f32 %v315_v4, %v248_v6  ;;  %v332_v12 = vmax.f32 %v324_v5, 0.0 }
 0x272   :  { %v568_v7 = vpop.f32.mrf.mxu0 }
 0x273   :  { %v327_v9 = vadd.f32 %v568_v7, %v263_v2  ;;  %v330_v15 = vmax.f32 %v316_v8, 0.0 }
 0x274   :  { %v318_v11 = vpop.f32.mrf.mxu0 }
 0x275   :  { %v333_v13 = vmax.f32 %v327_v9, 0.0  ;;  %v319_v14 = vadd.f32 %v318_v11, %v253_v10 }
 0x277   :  { %v340_v16 = vpack.c.bf16 %v333_v13, %v332_v12  ;;  %v331_v17 = vmax.f32 %v319_v14, 0.0 }
 0x279   :  { %v339_v18 = vpack.c.bf16 %v331_v17, %v330_v15  ;;  %569 = vmatprep.subr.bf16.mxu1 %v340_v16 }
 0x27a   :  { %570 = vmatpush3.bf16.msra.mxu1 %v340_v16 }
 0x27b   :  { %571 = vmatprep.subr.bf16.mxu1 %v339_v18 }
 0x27e   :  { %572 = vmatpush3.bf16.msra.mxu1 %v339_v18 }
 0x281   :  { %574 = vmatmul.mubr.msk.bf16.vlgmr.msra.gmra.mxu1 %vm173_vm2, %v598_v19 }
 0x341   :  { %v575_v23 = vpop.f32.mrf.mxu1 }
 0x342   :  { %v425_v25 = vadd.f32 %v575_v23, %v359_v21 }
 0x343   :  { %v416_v24 = vpop.f32.mrf.mxu1 }
 0x344   :  { %v433_v31 = vmax.f32 %v425_v25, 0.0  ;;  %v417_v32 = vadd.f32 %v416_v24, %v349_v27 }
 0x345   :  { %v576_v26 = vpop.f32.mrf.mxu1 }
 0x346   :  { %v428_v28 = vadd.f32 %v576_v26, %v364_v22  ;;  %v431_v37 = vmax.f32 %v417_v32, 0.0 }
 0x347   :  { %v419_v30 = vpop.f32.mrf.mxu1 }
 0x348   :  { %v434_v33 = vmax.f32 %v428_v28, 0.0  ;;  %v420_v34 = vadd.f32 %v419_v30, %v354_v29 }
 0x34a   :  { %v437_v35 = vpack.c.bf16 %v434_v33, %v433_v31  ;;  %v432_v36 = vmax.f32 %v420_v34, 0.0 }
 0x34c   :  { %578 = vmatpush3.bf16.msra.mxu0 %v437_v35  ;;  %v436_v38 = vpack.c.bf16 %v432_v36, %v431_v37 }
 0x34d   :  { %579 = vmatprep.subr.bf16.mxu0 %v600_v20 }
 0x350   :  { %580 = vmatpush3.bf16.msra.mxu0 %v436_v38 }
 0x353   :  { %582 = vmatmul.mubr.msk.bf16.vlgmr.msra.gmra.mxu0 %vm173_vm2, %v435_v39 }
 0x413   :  { %v485_v45 = vpop.f32.mrf.mxu0 }
 0x414   :  { %v486_v46 = vadd.f32 %v485_v45, %v447_v44 }
 0x415   :  { %v583_v47 = vpop.f32.mrf.mxu0 }
 0x416   :  { %491 = vst [vmem:[%s742_s7] sm:$0x1] %v486_v46 }
 0x417   :  { %v488_v48 = vpop.f32.mrf.mxu0 }
 0x419   :  { %v584_v49 = vpop.f32.mrf.mxu0 }

</bundles_post_ra>
